<compile_context>
chip_gen: v7x
topology: tpu7x:2x2x1
jax: 0.10.0
libtpu: 0.0.40
codegen_flags: <defaults>
</compile_context>

<pallas_src>
import jax
import jax.numpy as jnp
from jax.experimental import pallas as pl
from jax.experimental.pallas import tpu as pltpu


def _round_up(x, m):
    return ((x + m - 1) // m) * m


def _vmem_budget_bytes():
    """Per-generation scoped-VMEM budget (~75% of physical per-TC VMEM)."""
    try:
        cap = pltpu.get_tpu_info().vmem_capacity_bytes
    except Exception:
        cap = 64 * 1024 * 1024  # conservative fallback (v7x per-TC VMEM)
    return int(cap * 3 // 4)


def encoder_kernel(x_ref, w1_ref, b1_ref, w2_ref, b2_ref, o_ref):
    # One fused step per M tile (no K reduction loop): full-D_in blocks.
    #   x_ref : (tm, D_in)  bf16      w1_ref: (D_in, HID) bf16
    #   b1_ref: (1, HID)    f32       w2_ref: (HID, N_pad) bf16
    #   b2_ref: (1, N_pad)  f32       o_ref : (tm, N_pad)  f32
    h = jnp.dot(x_ref[...], w1_ref[...], preferred_element_type=jnp.float32)
    h = jnp.maximum(h + b1_ref[...], 0.0)          # bias + ReLU on f32 (VPU)
    y = jnp.dot(h.astype(jnp.bfloat16), w2_ref[...],
                preferred_element_type=jnp.float32)
    o_ref[...] = (y + b2_ref[...]).astype(o_ref.dtype)


def prepare_encoder_params(w1, b1, w2, b2):
    """One-time parameter prep, hoisted out of the forward hot path:
    bf16 weight cast, lane-dense padding of the output dim, bias reshape."""
    d_in, hid = w1.shape
    d_out = w2.shape[1]
    n_pad = _round_up(d_out, 128)                  # lane-dense => unmasked vst
    w1_bf = w1.astype(jnp.bfloat16)
    w2_bf = jnp.pad(w2, ((0, 0), (0, n_pad - d_out))).astype(jnp.bfloat16)
    b1_f = b1.reshape(1, hid).astype(jnp.float32)
    b2_f = jnp.pad(b2.reshape(1, d_out),
                   ((0, 0), (0, n_pad - d_out))).astype(jnp.float32)
    return dict(w1=w1_bf, b1=b1_f, w2=w2_bf, b2=b2_f)


def finetuner_forward(x_nchw, params, d_out):
    """FineTuner.forward == encoder(x). Flatten/pad/slice glue in plain JAX."""
    w1, b1, w2, b2 = params["w1"], params["b1"], params["w2"], params["b2"]
    d_in, hid = w1.shape
    n_pad = w2.shape[1]

    B = x_nchw.shape[0]
    x2d = x_nchw.reshape(B, d_in).astype(jnp.bfloat16)   # NCHW row-major flatten

    # Pad the batch to a full bf16 sublane group (16 rows per vreg).
    m_pad = _round_up(max(B, 16), 16)
    # tm=256 fills the 256-row MXU on v6e/v7x; v5e (128-row MXU) takes 2 pushes.
    tm = min(m_pad, 256)
    m_pad = _round_up(m_pad, tm)
    x2d = jnp.pad(x2d, ((0, m_pad - B), (0, 0)))

    grid = (m_pad // tm,)   # no K axis: everything fits VMEM at these shapes

    # VMEM sanity check: resident weights + per-step x/out buffers under budget.
    resident = 2 * (d_in * hid + hid * n_pad) + 4 * (hid + n_pad)
    per_step = (tm * d_in * 2) * 2 + (tm * n_pad * 4) * 2 + tm * hid * 4
    budget = _vmem_budget_bytes()
    assert resident + per_step < budget, "working set exceeds VMEM budget"
    # TODO(synk): for very large D_in/HID reintroduce a K-tiled reduction path
    # (tk = largest aligned divisor <= 1024) instead of full-K blocks.

    flops = 2 * m_pad * (d_in * hid + hid * n_pad)
    bytes_accessed = (x2d.size * 2 + w1.size * 2 + w2.size * 2
                      + b1.size * 4 + b2.size * 4 + m_pad * n_pad * 4)

    out_padded = pl.pallas_call(
        encoder_kernel,
        out_shape=jax.ShapeDtypeStruct((m_pad, n_pad), jnp.float32),
        grid_spec=pltpu.PrefetchScalarGridSpec(
            num_scalar_prefetch=0,
            grid=grid,
            in_specs=[
                pl.BlockSpec((tm, d_in), lambda i: (i, 0)),   # x tile (pipelined)
                pl.BlockSpec((d_in, hid), lambda i: (0, 0),
                             pipeline_mode=pl.Buffered(1)),   # w1 resident
                pl.BlockSpec((1, hid), lambda i: (0, 0),
                             pipeline_mode=pl.Buffered(1)),   # b1 resident
                pl.BlockSpec((hid, n_pad), lambda i: (0, 0),
                             pipeline_mode=pl.Buffered(1)),   # w2 resident
                pl.BlockSpec((1, n_pad), lambda i: (0, 0),
                             pipeline_mode=pl.Buffered(1)),   # b2 resident
            ],
            out_specs=pl.BlockSpec((tm, n_pad), lambda i: (i, 0)),
        ),
        compiler_params=pltpu.CompilerParams(
            dimension_semantics=("parallel",),
            vmem_limit_bytes=budget,
        ),
        cost_estimate=pl.CostEstimate(
            flops=flops, transcendentals=0, bytes_accessed=bytes_accessed),
    )(x2d, w1, b1, w2, b2)

    # Strip batch / lane padding.
    return out_padded[:B, :d_out]


if __name__ == "__main__":
    # Small shapes consistent with a conv-style NCHW input.
    B, C, H, W = 2, 4, 16, 16
    D_IN = C * H * W          # 1024
    HID = 128
    D_OUT = 64

    key = jax.random.PRNGKey(0)
    kx, k1, kb1, k2, kb2 = jax.random.split(key, 5)

    # Deterministic parameter init (synthetic, not a checkpoint load).
    x = jax.random.normal(kx, (B, C, H, W), dtype=jnp.float32)
    w1 = jax.random.normal(k1, (D_IN, HID), dtype=jnp.float32) / jnp.sqrt(D_IN)
    b1 = jax.random.normal(kb1, (1, HID), dtype=jnp.float32) * 0.1
    w2 = jax.random.normal(k2, (HID, D_OUT), dtype=jnp.float32) / jnp.sqrt(HID)
    b2 = jax.random.normal(kb2, (1, D_OUT), dtype=jnp.float32) * 0.1

    params = prepare_encoder_params(w1, b1, w2, b2)   # one-time prep, off hot path
    fwd = jax.jit(finetuner_forward, static_argnames="d_out")
    out = jax.block_until_ready(fwd(x, params, d_out=D_OUT))

    # Reference using the SAME bf16-input / f32-accumulate numerics.
    x_bf = x.reshape(B, D_IN).astype(jnp.bfloat16)
    h_ref = jnp.maximum(
        jnp.dot(x_bf, w1.astype(jnp.bfloat16),
                preferred_element_type=jnp.float32) + b1, 0.0)
    ref = jnp.dot(h_ref.astype(jnp.bfloat16), w2.astype(jnp.bfloat16),
                  preferred_element_type=jnp.float32) + b2

    assert out.shape == (B, D_OUT)
    assert jnp.allclose(out, ref, atol=1e-2, rtol=1e-2), (
        float(jnp.max(jnp.abs(out - ref))))

    # TODO(synk): projector/corrector submodules are unused in FineTuner.forward(); not implemented.
    print("KERNEL_OK")
</pallas_src>

<mosaic_0001>
module attributes {stable_mosaic.version = 11 : i64} {
  func.func @encoder_kernel(%arg0: i32, %arg1: memref<16x1024xbf16, #tpu.memory_space<vmem>>, %arg2: memref<1024x128xbf16, #tpu.memory_space<vmem>>, %arg3: memref<1x128xf32, #tpu.memory_space<vmem>>, %arg4: memref<128x128xbf16, #tpu.memory_space<vmem>>, %arg5: memref<1x128xf32, #tpu.memory_space<vmem>>, %arg6: memref<16x128xf32, #tpu.memory_space<vmem>>) attributes {dimension_semantics = [#tpu.dimension_semantics<parallel>], iteration_bounds = array<i64: 1>, scalar_prefetch = 0 : i64, scratch_operands = 0 : i64, tpu.core_type = #tpu.core_type<tc>, window_params = [{transform_indices = @transform_0, window_bounds = array<i64: 16, 1024>}, {pipeline_mode = #tpu.pipeline_mode<synchronous>, transform_indices = @transform_1, window_bounds = array<i64: 1024, 128>}, {pipeline_mode = #tpu.pipeline_mode<synchronous>, transform_indices = @transform_2, window_bounds = array<i64: 1, 128>}, {pipeline_mode = #tpu.pipeline_mode<synchronous>, transform_indices = @transform_3, window_bounds = array<i64: 128, 128>}, {pipeline_mode = #tpu.pipeline_mode<synchronous>, transform_indices = @transform_4, window_bounds = array<i64: 1, 128>}, {transform_indices = @transform_5, window_bounds = array<i64: 16, 128>}]} {
    %c0 = arith.constant 0 : index
    %c0_0 = arith.constant 0 : index
    %0 = vector.load %arg1[%c0, %c0_0] : memref<16x1024xbf16, #tpu.memory_space<vmem>>, vector<16x1024xbf16>
    %c0_1 = arith.constant 0 : index
    %c0_2 = arith.constant 0 : index
    %1 = vector.load %arg2[%c0_1, %c0_2] : memref<1024x128xbf16, #tpu.memory_space<vmem>>, vector<1024x128xbf16>
    %cst = arith.constant dense<0.000000e+00> : vector<16x128xf32>
    %2 = tpu.matmul %0, %1, %cst {dimension_numbers = #tpu.dot_dimension_numbers<[1], [0], [0], [1], [0, 0, 1, 1], [], []>} : vector<16x1024xbf16>, vector<1024x128xbf16>, vector<16x128xf32> -> vector<16x128xf32>
    %c0_3 = arith.constant 0 : index
    %c0_4 = arith.constant 0 : index
    %3 = vector.load %arg3[%c0_3, %c0_4] : memref<1x128xf32, #tpu.memory_space<vmem>>, vector<1x128xf32>
    %4 = vector.broadcast %3 : vector<1x128xf32> to vector<16x128xf32>
    %5 = arith.addf %2, %4 : vector<16x128xf32>
    %cst_5 = arith.constant 0.000000e+00 : f32
    %6 = vector.broadcast %cst_5 : f32 to vector<16x128xf32>
    %7 = arith.maximumf %5, %6 : vector<16x128xf32>
    %8 = arith.truncf %7 : vector<16x128xf32> to vector<16x128xbf16>
    %c0_6 = arith.constant 0 : index
    %c0_7 = arith.constant 0 : index
    %9 = vector.load %arg4[%c0_6, %c0_7] : memref<128x128xbf16, #tpu.memory_space<vmem>>, vector<128x128xbf16>
    %cst_8 = arith.constant dense<0.000000e+00> : vector<16x128xf32>
    %10 = tpu.matmul %8, %9, %cst_8 {dimension_numbers = #tpu.dot_dimension_numbers<[1], [0], [0], [1], [0, 0, 1, 1], [], []>} : vector<16x128xbf16>, vector<128x128xbf16>, vector<16x128xf32> -> vector<16x128xf32>
    %c0_9 = arith.constant 0 : index
    %c0_10 = arith.constant 0 : index
    %11 = vector.load %arg5[%c0_9, %c0_10] : memref<1x128xf32, #tpu.memory_space<vmem>>, vector<1x128xf32>
    %12 = vector.broadcast %11 : vector<1x128xf32> to vector<16x128xf32>
    %13 = arith.addf %10, %12 : vector<16x128xf32>
    %c0_11 = arith.constant 0 : index
    %c0_12 = arith.constant 0 : index
    %14 = vector.load %arg6[%c0_11, %c0_12] : memref<16x128xf32, #tpu.memory_space<vmem>>, vector<16x128xf32>
    tpu.vector_store %arg6[%c0_11, %c0_12], %13 {strides = array<i32>} : memref<16x128xf32, #tpu.memory_space<vmem>>, vector<16x128xf32>,
    return
  }
  func.func @transform_0(%arg0: i32) -> (i32, i32) {
    %c0_i32 = arith.constant 0 : i32
    %c0_i32_0 = arith.constant 0 : i32
    return %arg0, %c0_i32 : i32, i32
  }
  func.func @transform_1(%arg0: i32) -> (i32, i32) {
    %c0_i32 = arith.constant 0 : i32
    %c0_i32_0 = arith.constant 0 : i32
    %c0_i32_1 = arith.constant 0 : i32
    return %c0_i32, %c0_i32_0 : i32, i32
  }
  func.func @transform_2(%arg0: i32) -> (i32, i32) {
    %c0_i32 = arith.constant 0 : i32
    %c0_i32_0 = arith.constant 0 : i32
    %c0_i32_1 = arith.constant 0 : i32
    return %c0_i32, %c0_i32_0 : i32, i32
  }
  func.func @transform_3(%arg0: i32) -> (i32, i32) {
    %c0_i32 = arith.constant 0 : i32
    %c0_i32_0 = arith.constant 0 : i32
    %c0_i32_1 = arith.constant 0 : i32
    return %c0_i32, %c0_i32_0 : i32, i32
  }
  func.func @transform_4(%arg0: i32) -> (i32, i32) {
    %c0_i32 = arith.constant 0 : i32
    %c0_i32_0 = arith.constant 0 : i32
    %c0_i32_1 = arith.constant 0 : i32
    return %c0_i32, %c0_i32_0 : i32, i32
  }
  func.func @transform_5(%arg0: i32) -> (i32, i32) {
    %c0_i32 = arith.constant 0 : i32
    %c0_i32_0 = arith.constant 0 : i32
    return %arg0, %c0_i32 : i32, i32
  }
}

</mosaic_0001>

<bundles_post_ra>
// kernel: finetuner_forward.1
= control target key start
LH: loop header
LB: loop body
LE: loop exit
PB: predicated region body
PF: predicated region fallthrough
CT: control target
= control target key end

     0   :  { %10 = vsyncpa [#allocation3], 0  ;;  %s1188_s18 = smov [#allocation2]   ;;  %s1295_s0 = inlined_call_operand.vmem [shape: bf16[16,1024], index: 0, kind: input, shape index: {}]   ;;  %s1296_s1 = inlined_call_operand.hbm [shape: bf16[1024,128], index: 1, kind: input, shape index: {}]   ;;  %s1297_s2 = inlined_call_operand.vmem [shape: f32[1,128], index: 2, kind: input, shape index: {}]   ;;  %s1298_s3 = inlined_call_operand.vmem [shape: bf16[128,128], index: 3, kind: input, shape index: {}]   ;;  %s1299_s4 = inlined_call_operand.vmem [shape: f32[1,128], index: 4, kind: input, shape index: {}]   ;;  %s1300_s5 = inlined_call_operand.vmem [shape: f32[16,128], index: 5, kind: output, shape index: {}]  }
   0x1   :  { %s18_s19 = sshll.u32 %s1188_s18, 4  ;;  %s1164_s22 = scalar_lea.hbm %s1296_s1, 8192  ;;  %s19_s19 = int_to_ptr.vmem [resolvable:$true] %s18_s19 }
   0x2   :  { %p1165_p0 = scmp.ne.s32.totalorder %s1296_s1, %s1164_s22  ;;  %p1168_p1 = scmp.lt.u32.totalorder %s1164_s22, %s1296_s1 }
   0x4   :  { %p1170_p2 = pnand %p1168_p1, %p1165_p0 }
   0x6   :  { %1173 = shalt.err (!%p1170_p2)
}
   0x7   :  { %s1174_s27 = scalar_lea.vmem %s19_s19, 8192  ;;  %p1179_p4 = scmp.lt.s32.totalorder %s19_s19, %s19_s19 }
   0x8   :  { %p1175_p3 = scmp.ne.s32.totalorder %s19_s19, %s1174_s27  ;;  %p1180_p5 = scmp.lt.s32.totalorder %s1174_s27, %s1174_s27 }
   0xa   :  { %p1181_p6 = por %p1180_p5, %p1179_p4 }
   0xc   :  { %p1182_p7 = pnand %p1181_p6, %p1175_p3 }
   0xe   :  { %1185 = shalt.err (!%p1182_p7)
}
   0xf   :  { %s1189_s28 = smov 64   ;;  %s1190_s29 = smov 4  }
  0x10   :  { %24 = dma.hbm_to_vmem [thread:$0]  %s1296_s1, 8192, %s19_s19, [#allocation3], %s1189_s28, %s1189_s28, %s1190_s29  }
  0x11   :  { %1186 = dma.done.wait [#allocation3], 8192  }
  0x12   :  { %1187 = vsyncadd [#allocation3], 4294959104  ;;  %v1092_v0 = vld [vmem:[#allocation2 + $0x40] sm:$0xff]   ;;  %v1096_v4 = vld [vmem:[#allocation2 + $0x48] sm:$0xff]   ;;  %vm1192_vm0 = vmmov 0  }
  0x13   :  { %v1093_v1 = vld [vmem:[#allocation2 + $0xc0] sm:$0xff]   ;;  %970 = vmatprep.subr.bf16.mxu0 %v1092_v0  ;;  %v1097_v5 = vld [vmem:[#allocation2 + $0xc8] sm:$0xff]   ;;  %v1100_v8 = vld [vmem:[#allocation2 + $0x50] sm:$0xff]  }
  0x14   :  { %v1094_v2 = vld [vmem:[#allocation2] sm:$0xff]   ;;  %992 = vmatprep.subr.bf16.mxu1 %v1093_v1  ;;  %v1098_v6 = vld [vmem:[#allocation2 + $0x8] sm:$0xff]   ;;  %v1101_v9 = vld [vmem:[#allocation2 + $0xd0] sm:$0xff]  }
  0x15   :  { %v1095_v3 = vld [vmem:[#allocation2 + $0x80] sm:$0xff]   ;;  %971 = vmatpush3.bf16.msra.mxu0 %v1094_v2  ;;  %v1099_v7 = vld [vmem:[#allocation2 + $0x88] sm:$0xff]   ;;  %v1102_v10 = vld [vmem:[#allocation2 + $0x10] sm:$0xff]  }
  0x16   :  { %993 = vmatpush3.bf16.msra.mxu1 %v1095_v3  ;;  %972 = vmatprep.subr.bf16.mxu0 %v1096_v4  ;;  %v1103_v11 = vld [vmem:[#allocation2 + $0x90] sm:$0xff]   ;;  %v1104_v12 = vld [vmem:[#allocation2 + $0x58] sm:$0xff]   ;;  %v1108_v16 = vld [vmem:[#allocation2 + $0x60] sm:$0xff]  }
  0x17   :  { %994 = vmatprep.subr.bf16.mxu1 %v1097_v5  ;;  %v1105_v13 = vld [vmem:[#allocation2 + $0xd8] sm:$0xff]   ;;  %v1109_v17 = vld [vmem:[#allocation2 + $0xe0] sm:$0xff]   ;;  %v1112_v20 = vld [vmem:[#allocation2 + $0x68] sm:$0xff]  }
  0x18   :  { %v1106_v14 = vld [vmem:[#allocation2 + $0x18] sm:$0xff]   ;;  %v1110_v18 = vld [vmem:[#allocation2 + $0x20] sm:$0xff]   ;;  %v1113_v21 = vld [vmem:[#allocation2 + $0xe8] sm:$0xff]  }
  0x19   :  { %973 = vmatpush3.bf16.msra.mxu0 %v1098_v6  ;;  %v1107_v15 = vld [vmem:[#allocation2 + $0x98] sm:$0xff]   ;;  %v1111_v19 = vld [vmem:[#allocation2 + $0xa0] sm:$0xff]   ;;  %v1114_v22 = vld [vmem:[#allocation2 + $0x28] sm:$0xff]  }
  0x1a   :  { %995 = vmatpush3.bf16.msra.mxu1 %v1099_v7  ;;  %974 = vmatprep.subr.bf16.mxu0 %v1100_v8  ;;  %v1115_v23 = vld [vmem:[#allocation2 + $0xa8] sm:$0xff]   ;;  %v1116_v24 = vld [vmem:[#allocation2 + $0x70] sm:$0xff]   ;;  %v1120_v28 = vld [vmem:[#allocation2 + $0x78] sm:$0xff]  }
  0x1b   :  { %996 = vmatprep.subr.bf16.mxu1 %v1101_v9  ;;  %v1117_v25 = vld [vmem:[#allocation2 + $0xf0] sm:$0xff]   ;;  %v1121_v29 = vld [vmem:[#allocation2 + $0xf8] sm:$0xff]   ;;  %v35_v32 = vld [vmem:[%s1295_s0] sm:$0xff] }
  0x1c   :  { %v1118_v26 = vld [vmem:[#allocation2 + $0x30] sm:$0xff]   ;;  %v1122_v30 = vld [vmem:[#allocation2 + $0x38] sm:$0xff]   ;;  %v39_v33 = vld [vmem:[%s1295_s0 + $0x20] sm:$0xff] }
  0x1d   :  { %975 = vmatpush3.bf16.msra.mxu0 %v1102_v10  ;;  %v1119_v27 = vld [vmem:[#allocation2 + $0xb0] sm:$0xff]   ;;  %v1123_v31 = vld [vmem:[#allocation2 + $0xb8] sm:$0xff]   ;;  %v36_v34 = vld [vmem:[%s1295_s0 + $0x8] sm:$0xff]  ;;  %v889_v35 = vcombine.low %v35_v32, %v39_v33  ;;  %v890_v36 = vcombine.high %v35_v32, %v39_v33 }
  0x1e   :  { %997 = vmatpush3.bf16.msra.mxu1 %v1103_v11  ;;  %976 = vmatprep.subr.bf16.mxu0 %v1104_v12  ;;  %v40_v37 = vld [vmem:[%s1295_s0 + $0x28] sm:$0xff]  ;;  %v1124_v40 = vld [vmem:[#allocation2 + $0x140] sm:$0xff]   ;;  %v1132_v48 = vld [vmem:[#allocation2 + $0x150] sm:$0xff]  }
  0x1f   :  { %998 = vmatprep.subr.bf16.mxu1 %v1105_v13  ;;  %v891_v38 = vcombine.low %v36_v34, %v40_v37  ;;  %v892_v39 = vcombine.high %v36_v34, %v40_v37  ;;  %634 = vmatprep.mubr.bf16.mxu0 %v890_v36  ;;  %v1125_v41 = vld [vmem:[#allocation2 + $0x1c0] sm:$0xff]   ;;  %v1128_v44 = vld [vmem:[#allocation2 + $0x148] sm:$0xff]   ;;  %v1133_v49 = vld [vmem:[#allocation2 + $0x1d0] sm:$0xff]  }
  0x20   :  { %v1126_v42 = vld [vmem:[#allocation2 + $0x100] sm:$0xff]   ;;  %v1129_v45 = vld [vmem:[#allocation2 + $0x1c8] sm:$0xff]   ;;  %v1134_v50 = vld [vmem:[#allocation2 + $0x110] sm:$0xff]  }
  0x21   :  { %977 = vmatpush3.bf16.msra.mxu0 %v1106_v14  ;;  %675 = vmatprep.mubr.bf16.mxu1 %v892_v39  ;;  %v1127_v43 = vld [vmem:[#allocation2 + $0x180] sm:$0xff]   ;;  %v1130_v46 = vld [vmem:[#allocation2 + $0x108] sm:$0xff]   ;;  %v1135_v51 = vld [vmem:[#allocation2 + $0x190] sm:$0xff]  }
  0x22   :  { %999 = vmatpush3.bf16.msra.mxu1 %v1107_v15  ;;  %978 = vmatprep.subr.bf16.mxu0 %v1108_v16  ;;  %v1131_v47 = vld [vmem:[#allocation2 + $0x188] sm:$0xff]   ;;  %v1136_v52 = vld [vmem:[#allocation2 + $0x158] sm:$0xff]   ;;  %v1140_v56 = vld [vmem:[#allocation2 + $0x160] sm:$0xff]  }
  0x23   :  { %1000 = vmatprep.subr.bf16.mxu1 %v1109_v17  ;;  %v1137_v53 = vld [vmem:[#allocation2 + $0x1d8] sm:$0xff]   ;;  %v1141_v57 = vld [vmem:[#allocation2 + $0x1e0] sm:$0xff]   ;;  %v1144_v60 = vld [vmem:[#allocation2 + $0x168] sm:$0xff]   ;;  %v1191_v17 = vmov 0.0  }
  0x24   :  { %v1138_v54 = vld [vmem:[#allocation2 + $0x118] sm:$0xff]   ;;  %v1142_v58 = vld [vmem:[#allocation2 + $0x120] sm:$0xff]   ;;  %v1145_v61 = vld [vmem:[#allocation2 + $0x1e8] sm:$0xff]  }
  0x25   :  { %979 = vmatpush3.bf16.msra.mxu0 %v1110_v18  ;;  %v1139_v55 = vld [vmem:[#allocation2 + $0x198] sm:$0xff]   ;;  %v1143_v59 = vld [vmem:[#allocation2 + $0x1a0] sm:$0xff]   ;;  %v1146_v62 = vld [vmem:[#allocation2 + $0x128] sm:$0xff]  }
  0x26   :  { %1001 = vmatpush3.bf16.msra.mxu1 %v1111_v19  ;;  %980 = vmatprep.subr.bf16.mxu0 %v1112_v20  ;;  %v1147_v63 = vld [vmem:[#allocation2 + $0x1a8] sm:$0xff]   ;;  %v1148_v0 = vld [vmem:[#allocation2 + $0x170] sm:$0xff]   ;;  %v1152_v4 = vld [vmem:[#allocation2 + $0x178] sm:$0xff]  }
  0x27   :  { %1002 = vmatprep.subr.bf16.mxu1 %v1113_v21  ;;  %v1149_v1 = vld [vmem:[#allocation2 + $0x1f0] sm:$0xff]   ;;  %v1153_v5 = vld [vmem:[#allocation2 + $0x1f8] sm:$0xff]   ;;  %v1156_v16 = vld [vmem:[%s1298_s3] sm:$0xff]  }
  0x28   :  { %v1150_v2 = vld [vmem:[#allocation2 + $0x130] sm:$0xff]   ;;  %v1154_v6 = vld [vmem:[#allocation2 + $0x138] sm:$0xff]   ;;  %v1157_v18 = vld [vmem:[%s1298_s3 + $0x8] sm:$0xff]  }
  0x29   :  { %981 = vmatpush3.bf16.msra.mxu0 %v1114_v22  ;;  %v1151_v3 = vld [vmem:[#allocation2 + $0x1b0] sm:$0xff]   ;;  %v1155_v7 = vld [vmem:[#allocation2 + $0x1b8] sm:$0xff]   ;;  %v1160_v21 = vld [vmem:[%s1298_s3 + $0x20] sm:$0xff]  }
  0x2a   :  { %1003 = vmatpush3.bf16.msra.mxu1 %v1115_v23  ;;  %982 = vmatprep.subr.bf16.mxu0 %v1116_v24  ;;  %v37_v8 = vld [vmem:[%s1295_s0 + $0x10] sm:$0xff]  ;;  %v38_v12 = vld [vmem:[%s1295_s0 + $0x18] sm:$0xff]  ;;  %v1161_v22 = vld [vmem:[%s1298_s3 + $0x28] sm:$0xff]  }
  0x2b   :  { %1004 = vmatprep.subr.bf16.mxu1 %v1117_v25  ;;  %v41_v9 = vld [vmem:[%s1295_s0 + $0x30] sm:$0xff]  ;;  %v42_v13 = vld [vmem:[%s1295_s0 + $0x38] sm:$0xff] }
  0x2c   :  { %v893_v10 = vcombine.low %v37_v8, %v41_v9  ;;  %v894_v11 = vcombine.high %v37_v8, %v41_v9  ;;  %v895_v14 = vcombine.low %v38_v12, %v42_v13  ;;  %v896_v15 = vcombine.high %v38_v12, %v42_v13  ;;  %v1158_v19 = vld [vmem:[%s1298_s3 + $0x10] sm:$0xff]   ;;  %v1159_v20 = vld [vmem:[%s1298_s3 + $0x18] sm:$0xff]  }
  0x2d   :  { %983 = vmatpush3.bf16.msra.mxu0 %v1118_v26  ;;  %v1162_v23 = vld [vmem:[%s1298_s3 + $0x30] sm:$0xff]   ;;  %v1163_v24 = vld [vmem:[%s1298_s3 + $0x38] sm:$0xff]  }
  0x2e   :  { %1005 = vmatpush3.bf16.msra.mxu1 %v1119_v27  ;;  %984 = vmatprep.subr.bf16.mxu0 %v1120_v28  ;;  %v888_v27 = vld [vmem:[%s1297_s2] ss:$0 sm:$0xff] }
  0x2f   :  { %1006 = vmatprep.subr.bf16.mxu1 %v1121_v29 }
  0x31   :  { %985 = vmatpush3.bf16.msra.mxu0 %v1122_v30 }
  0x32   :  { %1007 = vmatpush3.bf16.msra.mxu1 %v1123_v31  ;;  %1014 = vmatprep.subr.bf16.mxu0 %v1124_v40 }
  0x33   :  { %1036 = vmatprep.subr.bf16.mxu1 %v1125_v41 }
  0x34   :  { %635 = vmatmul.mubr.bf16.vlgmr.msra.gmra.mrb[0].mxu0 %v889_v35 }
  0x35   :  { %676 = vmatmul.mubr.bf16.vlgmr.msra.gmra.mrb[0].mxu1 %v891_v38  ;;  %1015 = vmatpush3.bf16.msra.mxu0 %v1126_v42 }
  0x36   :  { %1037 = vmatpush3.bf16.msra.mxu1 %v1127_v43  ;;  %1016 = vmatprep.subr.bf16.mxu0 %v1128_v44 }
  0x37   :  { %1038 = vmatprep.subr.bf16.mxu1 %v1129_v45  ;;  %716 = vmatprep.mubr.bf16.mxu0 %v894_v11 }
  0x38   :  { %757 = vmatprep.mubr.bf16.mxu1 %v896_v15 }
  0x39   :  { %1017 = vmatpush3.bf16.msra.mxu0 %v1130_v46 }
  0x3a   :  { %1039 = vmatpush3.bf16.msra.mxu1 %v1131_v47  ;;  %1018 = vmatprep.subr.bf16.mxu0 %v1132_v48 }
  0x3b   :  { %1040 = vmatprep.subr.bf16.mxu1 %v1133_v49 }
  0x3d   :  { %1019 = vmatpush3.bf16.msra.mxu0 %v1134_v50 }
  0x3e   :  { %1041 = vmatpush3.bf16.msra.mxu1 %v1135_v51  ;;  %1020 = vmatprep.subr.bf16.mxu0 %v1136_v52 }
  0x3f   :  { %1042 = vmatprep.subr.bf16.mxu1 %v1137_v53 }
  0x41   :  { %1021 = vmatpush3.bf16.msra.mxu0 %v1138_v54 }
  0x42   :  { %1043 = vmatpush3.bf16.msra.mxu1 %v1139_v55  ;;  %1022 = vmatprep.subr.bf16.mxu0 %v1140_v56 }
  0x43   :  { %1044 = vmatprep.subr.bf16.mxu1 %v1141_v57 }
  0x45   :  { %1023 = vmatpush3.bf16.msra.mxu0 %v1142_v58 }
  0x46   :  { %1045 = vmatpush3.bf16.msra.mxu1 %v1143_v59  ;;  %1024 = vmatprep.subr.bf16.mxu0 %v1144_v60 }
  0x47   :  { %1046 = vmatprep.subr.bf16.mxu1 %v1145_v61  ;;  %v961_v61 = vld [vmem:[%s1299_s4] ss:$0 sm:$0xff] }
  0x49   :  { %1025 = vmatpush3.bf16.msra.mxu0 %v1146_v62 }
  0x4a   :  { %1047 = vmatpush3.bf16.msra.mxu1 %v1147_v63  ;;  %1026 = vmatprep.subr.bf16.mxu0 %v1148_v0 }
  0x4b   :  { %1048 = vmatprep.subr.bf16.mxu1 %v1149_v1 }
  0x4d   :  { %1027 = vmatpush3.bf16.msra.mxu0 %v1150_v2 }
  0x4e   :  { %1049 = vmatpush3.bf16.msra.mxu1 %v1151_v3  ;;  %1028 = vmatprep.subr.bf16.mxu0 %v1152_v4 }
  0x4f   :  { %1050 = vmatprep.subr.bf16.mxu1 %v1153_v5 }
  0x51   :  { %1029 = vmatpush3.bf16.msra.mxu0 %v1154_v6 }
  0x52   :  { %1051 = vmatpush3.bf16.msra.mxu1 %v1155_v7  ;;  %1067 = vmatprep.subr.bf16.mxu0 %v1191_v17 }
  0x54   :  { %717 = vmatmul.mubr.bf16.vlgmr.msra.gmra.mrb[4].mxu0 %v893_v10 }
  0x55   :  { %758 = vmatmul.mubr.bf16.vlgmr.msra.gmra.mrb[4].mxu1 %v895_v14  ;;  %1068 = vmatpush3.bf16.msra.mxu0 %v1156_v16 }
  0x56   :  { %1069 = vmatprep.subr.bf16.mxu0 %v1191_v17  ;;  %1083 = vmatprep.mubr.msk.bf16.mxu0 %vm1192_vm0, %v1191_v17 }
  0x59   :  { %1070 = vmatpush3.bf16.msra.mxu0 %v1157_v18 }
  0x5a   :  { %1071 = vmatprep.subr.bf16.mxu0 %v1191_v17 }
  0x5d   :  { %1072 = vmatpush3.bf16.msra.mxu0 %v1158_v19 }
  0x5e   :  { %1073 = vmatprep.subr.bf16.mxu0 %v1191_v17 }
  0x61   :  { %1074 = vmatpush3.bf16.msra.mxu0 %v1159_v20 }
  0x62   :  { %1075 = vmatprep.subr.bf16.mxu0 %v1191_v17 }
  0x65   :  { %1076 = vmatpush3.bf16.msra.mxu0 %v1160_v21 }
  0x66   :  { %1077 = vmatprep.subr.bf16.mxu0 %v1191_v17 }
  0x69   :  { %1078 = vmatpush3.bf16.msra.mxu0 %v1161_v22 }
  0x6a   :  { %1079 = vmatprep.subr.bf16.mxu0 %v1191_v17 }
  0x6d   :  { %1080 = vmatpush3.bf16.msra.mxu0 %v1162_v23 }
  0x6e   :  { %1081 = vmatprep.subr.bf16.mxu0 %v1191_v17 }
  0x71   :  { %1082 = vmatpush3.bf16.msra.mxu0 %v1163_v24 }
 0x107   :  { %v986_v25 = vpop.f32.mrb[0].mxu0 }
 0x108   :  { %v1008_v26 = vpop.f32.mrb[0].mxu1  ;;  %v987_v28 = vpop.f32.mrb[1].mxu0 }
 0x109   :  { %v988_v29 = vadd.f32 %v987_v28, %v986_v25  ;;  %v1009_v30 = vpop.f32.mrb[1].mxu1  ;;  %v989_v31 = vpop.f32.mrb[2].mxu0 }
 0x10a   :  { %v1010_v32 = vadd.f32 %v1009_v30, %v1008_v26  ;;  %v1011_v33 = vpop.f32.mrb[2].mxu1  ;;  %v990_v34 = vpop.f32.mrb[3].mxu0 }
 0x10b   :  { %v637_v35 = vadd.f32 %v988_v29, %v888_v27  ;;  %v991_v36 = vadd.f32 %v990_v34, %v989_v31  ;;  %v1012_v37 = vpop.f32.mrb[3].mxu1 }
 0x10c   :  { %v1013_v38 = vadd.f32 %v1012_v37, %v1011_v33 }
 0x10d   :  { %v678_v39 = vadd.f32 %v1010_v32, %v637_v35  ;;  %v640_v40 = vadd.f32 %v991_v36, %v888_v27 }
 0x10f   :  { %v681_v41 = vadd.f32 %v1013_v38, %v640_v40 }
 0x127   :  { %v1030_v42 = vpop.f32.mrb[4].mxu0 }
 0x128   :  { %v1052_v43 = vpop.f32.mrb[4].mxu1  ;;  %v1031_v44 = vpop.f32.mrb[5].mxu0 }
 0x129   :  { %v1032_v45 = vadd.f32 %v1031_v44, %v1030_v42  ;;  %v1053_v46 = vpop.f32.mrb[5].mxu1  ;;  %v1033_v47 = vpop.f32.mrb[6].mxu0 }
 0x12a   :  { %v1054_v48 = vadd.f32 %v1053_v46, %v1052_v43  ;;  %v1055_v49 = vpop.f32.mrb[6].mxu1  ;;  %v1034_v50 = vpop.f32.mrb[7].mxu0 }
 0x12b   :  { %v719_v51 = vadd.f32 %v1032_v45, %v678_v39  ;;  %v1035_v52 = vadd.f32 %v1034_v50, %v1033_v47  ;;  %v1056_v53 = vpop.f32.mrb[7].mxu1 }
 0x12c   :  { %v1057_v54 = vadd.f32 %v1056_v53, %v1055_v49 }
 0x12d   :  { %v760_v55 = vadd.f32 %v1054_v48, %v719_v51  ;;  %v722_v56 = vadd.f32 %v1035_v52, %v681_v41 }
 0x12f   :  { %v763_v57 = vadd.f32 %v1057_v54, %v722_v56  ;;  %v766_v58 = vmax.f32 %v760_v55, 0.0 }
 0x131   :  { %v767_v59 = vmax.f32 %v763_v57, 0.0 }
 0x133   :  { %v768_v60 = vpack.c.bf16 %v767_v59, %v766_v58 }
 0x135   :  { %1084 = vmatmul.mubr.bf16.vlgmr.msra.gmra.mrb[8].mxu0 %v768_v60 }
 0x208   :  { %v874_v62 = vpop.f32.mrb[8].mxu0 }
 0x209   :  { %v875_v63 = vadd.f32 %v961_v61, %v874_v62  ;;  %v1085_v0 = vpop.f32.mrb[9].mxu0 }
 0x20a   :  { %v877_v1 = vpop.f32.mrb[10].mxu0 }
 0x20b   :  { %881 = vst [vmem:[%s1300_s5] sm:$0xff] %v875_v63  ;;  %v878_v2 = vadd.f32 %v961_v61, %v877_v1  ;;  %v1086_v3 = vpop.f32.mrb[11].mxu0 }
 0x20d   :  { %882 = vst [vmem:[%s1300_s5 + $0x8] sm:$0xff] %v878_v2 }
 0x20e   :  { %887 = vsyncpa [#allocation3], 1 }

</bundles_post_ra>
